<compile_context>
chip_gen: v6e
topology: v6e:2x2x1
jax: 0.10.0
libtpu: 0.0.40
codegen_flags: <defaults>
</compile_context>

<pallas_src>
import functools

import jax
import jax.numpy as jnp
from jax.experimental import pallas as pl
from jax.experimental.pallas import tpu as pltpu


# ----------------------------------------------------------------------------
# Pallas kernels
# ----------------------------------------------------------------------------
def _matmul_bias_kernel(p_ref, w_ref, b_ref, o_ref, *, relu):
    # p_ref: (m_tile, K)   w_ref: (K, N)   b_ref: (1, N)   o_ref: (m_tile, N)
    acc = jnp.dot(p_ref[...], w_ref[...], preferred_element_type=jnp.float32)
    acc = acc + b_ref[...]
    if relu:
        acc = jnp.maximum(acc, 0.0)
    o_ref[...] = acc.astype(o_ref.dtype)


def _matmul_bias_add_relu_kernel(p_ref, w_ref, b_ref, r_ref, o_ref):
    # Fused: conv+BN + residual add + ReLU (saves one HBM round-trip).
    acc = jnp.dot(p_ref[...], w_ref[...], preferred_element_type=jnp.float32)
    acc = acc + b_ref[...] + r_ref[...]
    o_ref[...] = jnp.maximum(acc, 0.0).astype(o_ref.dtype)


def _maxpool_kernel(x_ref, o_ref, *, n_win):
    # x_ref: (n_win, m_tile, C)  -> elementwise max over the window axis (VALU only).
    m = x_ref[0]
    for k in range(1, n_win):
        m = jnp.maximum(m, x_ref[k])
    o_ref[...] = m


# ----------------------------------------------------------------------------
# Wrappers
# ----------------------------------------------------------------------------
def _round_up(x, m):
    return ((x + m - 1) // m) * m


_VMEM_LIMIT = 32 * 1024 * 1024  # safe on v5e/v6e/v7x; our tiles are far smaller


def conv_bn_pallas(x, w, scale, shift, *, stride=1, relu=False, residual=None):
    """Conv2d(bias=False, 'same'-style padding k//2) + folded inference BN.

    x:        (B, H, W, Cin)  float32, NHWC
    w:        (KH, KW, Cin, Cout) HWIO
    scale:    (Cout,)  = gamma / sqrt(var + eps)
    shift:    (Cout,)  = beta - mean * scale
    residual: optional (B, Ho, Wo, Cout); when given, output = relu(conv_bn + residual)
    """
    B, H, W, Cin = x.shape
    KH, KW, _, Cout = w.shape
    ph, pw = KH // 2, KW // 2
    Ho = (H + 2 * ph - KH) // stride + 1
    Wo = (W + 2 * pw - KW) // stride + 1

    # im2col in the wrapper (layout glue only); feature ordering = (kh, kw, cin).
    x_pad = jnp.pad(x, ((0, 0), (ph, ph), (pw, pw), (0, 0)))
    cols = []
    for kh in range(KH):
        for kw in range(KW):
            cols.append(
                x_pad[:, kh:kh + stride * (Ho - 1) + 1:stride,
                         kw:kw + stride * (Wo - 1) + 1:stride, :])
    K = KH * KW * Cin
    M = B * Ho * Wo
    patches = jnp.concatenate(cols, axis=-1).reshape(M, K)

    # Fold the BN scale into the weights; BN shift becomes the bias row.
    w_mat = (w.reshape(K, Cout) * scale[None, :]).astype(jnp.float32)
    b_row = shift.reshape(1, Cout).astype(jnp.float32)

    # Row tiling (parallel grid axis -> pipelined DMA, multi-TC friendly).
    m_tile = min(256, _round_up(M, 8))
    m_pad = _round_up(M, m_tile)
    if m_pad != M:
        patches = jnp.pad(patches, ((0, m_pad - M), (0, 0)))

    in_arrays = [patches, w_mat, b_row]
    in_specs = [
        pl.BlockSpec((m_tile, K), lambda i: (i, 0)),
        pl.BlockSpec((K, Cout), lambda i: (0, 0)),
        pl.BlockSpec((1, Cout), lambda i: (0, 0)),
    ]

    if residual is None:
        kernel = functools.partial(_matmul_bias_kernel, relu=relu)
    else:
        r = residual.reshape(M, Cout).astype(jnp.float32)
        if m_pad != M:
            r = jnp.pad(r, ((0, m_pad - M), (0, 0)))
        in_arrays.append(r)
        in_specs.append(pl.BlockSpec((m_tile, Cout), lambda i: (i, 0)))
        kernel = _matmul_bias_add_relu_kernel

    out = pl.pallas_call(
        kernel,
        out_shape=jax.ShapeDtypeStruct((m_pad, Cout), jnp.float32),
        grid_spec=pltpu.PrefetchScalarGridSpec(
            num_scalar_prefetch=0,
            grid=(m_pad // m_tile,),
            in_specs=in_specs,
            out_specs=pl.BlockSpec((m_tile, Cout), lambda i: (i, 0)),
        ),
        compiler_params=pltpu.CompilerParams(
            dimension_semantics=("parallel",),
            vmem_limit_bytes=_VMEM_LIMIT),
    )(*in_arrays)

    return out[:M].reshape(B, Ho, Wo, Cout)


def maxpool3x3_s2_pallas(x):
    """MaxPool2d(kernel_size=3, stride=2, padding=1), NHWC."""
    B, H, W, C = x.shape
    Ho = (H + 2 - 3) // 2 + 1
    Wo = (W + 2 - 3) // 2 + 1
    neg = float(jnp.finfo(x.dtype).min)
    x_pad = jnp.pad(x, ((0, 0), (1, 1), (1, 1), (0, 0)), constant_values=neg)

    wins = []
    for kh in range(3):
        for kw in range(3):
            wins.append(
                x_pad[:, kh:kh + 2 * (Ho - 1) + 1:2,
                         kw:kw + 2 * (Wo - 1) + 1:2, :])
    M = B * Ho * Wo
    stacked = jnp.stack(wins, axis=0).reshape(9, M, C)

    m_tile = min(256, _round_up(M, 8))
    m_pad = _round_up(M, m_tile)
    if m_pad != M:
        stacked = jnp.pad(stacked, ((0, 0), (0, m_pad - M), (0, 0)))

    out = pl.pallas_call(
        functools.partial(_maxpool_kernel, n_win=9),
        out_shape=jax.ShapeDtypeStruct((m_pad, C), x.dtype),
        grid_spec=pltpu.PrefetchScalarGridSpec(
            num_scalar_prefetch=0,
            grid=(m_pad // m_tile,),
            in_specs=[pl.BlockSpec((9, m_tile, C), lambda i: (0, i, 0))],
            out_specs=pl.BlockSpec((m_tile, C), lambda i: (i, 0)),
        ),
        compiler_params=pltpu.CompilerParams(
            dimension_semantics=("parallel",),
            vmem_limit_bytes=_VMEM_LIMIT),
    )(stacked)

    return out[:M].reshape(B, Ho, Wo, C)


# ----------------------------------------------------------------------------
# Encoder forward (Pallas) and parameter construction
# ----------------------------------------------------------------------------
def encoder_forward(x_nchw, params):
    x = jnp.transpose(x_nchw, (0, 2, 3, 1)).astype(jnp.float32)  # NHWC

    g = params["gate"]
    x = conv_bn_pallas(x, g["w"], g["scale"], g["shift"], stride=2, relu=True)
    x = maxpool3x3_s2_pallas(x)

    for blk in params["blocks"]:
        if blk["shortcut"] is not None:
            s = blk["shortcut"]
            residual = conv_bn_pallas(x, s["w"], s["scale"], s["shift"],
                                      stride=blk["stride"], relu=False)
        else:
            residual = x
        y = conv_bn_pallas(x, blk["conv1"]["w"], blk["conv1"]["scale"],
                           blk["conv1"]["shift"], stride=blk["stride"], relu=True)
        x = conv_bn_pallas(y, blk["conv2"]["w"], blk["conv2"]["scale"],
                           blk["conv2"]["shift"], stride=1, relu=True,
                           residual=residual)

    return jnp.transpose(x, (0, 3, 1, 2))  # back to NCHW


def _make_conv_bn(key, kh, kw, cin, cout, eps=1e-5):
    kw_, kg, kb, km, kv = jax.random.split(key, 5)
    bound = 1.0 / float((kh * kw * cin) ** 0.5)
    w = jax.random.uniform(kw_, (kh, kw, cin, cout), jnp.float32, -bound, bound)
    gamma = jax.random.uniform(kg, (cout,), jnp.float32, 0.5, 1.5)
    beta = 0.1 * jax.random.normal(kb, (cout,), jnp.float32)
    mean = 0.1 * jax.random.normal(km, (cout,), jnp.float32)
    var = jax.random.uniform(kv, (cout,), jnp.float32, 0.5, 1.5)
    scale = gamma / jnp.sqrt(var + eps)
    shift = beta - mean * scale
    return dict(w=w, scale=scale, shift=shift)


def make_encoder_params(key, in_channels, blocks_size, deepths):
    keys = iter(jax.random.split(key, 128))
    params = {"gate": _make_conv_bn(next(keys), 7, 7, in_channels, blocks_size[0]),
              "blocks": []}
    layer_io = [(blocks_size[0], blocks_size[0], deepths[0])]
    layer_io += [(cin, cout, n)
                 for (cin, cout), n in zip(zip(blocks_size, blocks_size[1:]), deepths[1:])]
    for cin, cout, n in layer_io:
        downsampling = 2 if cin != cout else 1
        block_io = [(cin, cout, downsampling)] + [(cout, cout, 1)] * (n - 1)
        for b_in, b_out, stride in block_io:
            blk = dict(
                stride=stride,
                conv1=_make_conv_bn(next(keys), 3, 3, b_in, b_out),
                conv2=_make_conv_bn(next(keys), 3, 3, b_out, b_out),
                shortcut=(_make_conv_bn(next(keys), 1, 1, b_in, b_out)
                          if b_in != b_out else None),
            )
            params["blocks"].append(blk)
    return params


# ----------------------------------------------------------------------------
# Pure-JAX reference (for the self-check)
# ----------------------------------------------------------------------------
def _conv_bn_ref(x, w, scale, shift, *, stride, relu, residual=None):
    ph, pw = w.shape[0] // 2, w.shape[1] // 2
    y = jax.lax.conv_general_dilated(
        x, w, window_strides=(stride, stride),
        padding=((ph, ph), (pw, pw)),
        dimension_numbers=("NHWC", "HWIO", "NHWC"))
    y = y * scale + shift
    if residual is not None:
        y = y + residual
    if relu:
        y = jnp.maximum(y, 0.0)
    return y


def _maxpool_ref(x):
    return jax.lax.reduce_window(
        x, jnp.array(-jnp.inf, x.dtype), jax.lax.max,
        (1, 3, 3, 1), (1, 2, 2, 1),
        padding=((0, 0), (1, 1), (1, 1), (0, 0)))


def encoder_reference(x_nchw, params):
    x = jnp.transpose(x_nchw, (0, 2, 3, 1)).astype(jnp.float32)
    g = params["gate"]
    x = _conv_bn_ref(x, g["w"], g["scale"], g["shift"], stride=2, relu=True)
    x = _maxpool_ref(x)
    for blk in params["blocks"]:
        if blk["shortcut"] is not None:
            s = blk["shortcut"]
            residual = _conv_bn_ref(x, s["w"], s["scale"], s["shift"],
                                    stride=blk["stride"], relu=False)
        else:
            residual = x
        y = _conv_bn_ref(x, blk["conv1"]["w"], blk["conv1"]["scale"],
                         blk["conv1"]["shift"], stride=blk["stride"], relu=True)
        x = _conv_bn_ref(y, blk["conv2"]["w"], blk["conv2"]["scale"],
                         blk["conv2"]["shift"], stride=1, relu=True,
                         residual=residual)
    return jnp.transpose(x, (0, 3, 1, 2))


# ----------------------------------------------------------------------------
if __name__ == "__main__":
    # Small deterministic Encoder: in_channels=3, blocks_size=[8, 16], deepths=[1, 1]
    B, Cin, H, W = 2, 3, 32, 32
    blocks_size = [8, 16]
    deepths = [1, 1]

    key = jax.random.PRNGKey(0)
    kx, kp = jax.random.split(key)
    x = jax.random.normal(kx, (B, Cin, H, W), dtype=jnp.float32)
    params = make_encoder_params(kp, Cin, blocks_size, deepths)

    out = encoder_forward(x, params)
    out = jax.block_until_ready(out)

    ref = encoder_reference(x, params)
    assert out.shape == ref.shape == (B, blocks_size[-1], 4, 4), (out.shape, ref.shape)
    assert bool(jnp.all(jnp.isfinite(out)))
    max_err = float(jnp.max(jnp.abs(out - ref)))
    assert jnp.allclose(out, ref, rtol=5e-2, atol=5e-2), f"max abs err {max_err}"

    print("KERNEL_OK")
</pallas_src>

<mosaic_0001>
module attributes {stable_mosaic.version = 11 : i64} {
  func.func @_matmul_bias_kernel(%arg0: i32, %arg1: memref<256x147xf32, #tpu.memory_space<vmem>>, %arg2: memref<147x8xf32, #tpu.memory_space<vmem>>, %arg3: memref<1x8xf32, #tpu.memory_space<vmem>>, %arg4: memref<256x8xf32, #tpu.memory_space<vmem>>) attributes {dimension_semantics = [#tpu.dimension_semantics<parallel>], iteration_bounds = array<i64: 2>, scalar_prefetch = 0 : i64, scratch_operands = 0 : i64, tpu.core_type = #tpu.core_type<tc>, window_params = [{transform_indices = @transform_0, window_bounds = array<i64: 256, 147>}, {pipeline_mode = #tpu.pipeline_mode<synchronous>, transform_indices = @transform_1, window_bounds = array<i64: 147, 8>}, {pipeline_mode = #tpu.pipeline_mode<synchronous>, transform_indices = @transform_2, window_bounds = array<i64: 1, 8>}, {transform_indices = @transform_3, window_bounds = array<i64: 256, 8>}]} {
    %c0 = arith.constant 0 : index
    %c0_0 = arith.constant 0 : index
    %0 = vector.load %arg1[%c0, %c0_0] : memref<256x147xf32, #tpu.memory_space<vmem>>, vector<256x147xf32>
    %c0_1 = arith.constant 0 : index
    %c0_2 = arith.constant 0 : index
    %1 = vector.load %arg2[%c0_1, %c0_2] : memref<147x8xf32, #tpu.memory_space<vmem>>, vector<147x8xf32>
    %cst = arith.constant dense<0.000000e+00> : vector<256x8xf32>
    %2 = tpu.matmul %0, %1, %cst {dimension_numbers = #tpu.dot_dimension_numbers<[1], [0], [0], [1], [0, 0, 1, 1], [], []>} : vector<256x147xf32>, vector<147x8xf32>, vector<256x8xf32> -> vector<256x8xf32>
    %c0_3 = arith.constant 0 : index
    %c0_4 = arith.constant 0 : index
    %3 = vector.load %arg3[%c0_3, %c0_4] : memref<1x8xf32, #tpu.memory_space<vmem>>, vector<1x8xf32>
    %4 = vector.broadcast %3 : vector<1x8xf32> to vector<256x8xf32>
    %5 = arith.addf %2, %4 : vector<256x8xf32>
    %cst_5 = arith.constant 0.000000e+00 : f32
    %6 = vector.broadcast %cst_5 : f32 to vector<256x8xf32>
    %7 = arith.maximumf %5, %6 : vector<256x8xf32>
    %c0_6 = arith.constant 0 : index
    %c0_7 = arith.constant 0 : index
    %8 = vector.load %arg4[%c0_6, %c0_7] : memref<256x8xf32, #tpu.memory_space<vmem>>, vector<256x8xf32>
    tpu.vector_store %arg4[%c0_6, %c0_7], %7 {strides = array<i32>} : memref<256x8xf32, #tpu.memory_space<vmem>>, vector<256x8xf32>,
    return
  }
  func.func @transform_0(%arg0: i32) -> (i32, i32) {
    %c0_i32 = arith.constant 0 : i32
    %c0_i32_0 = arith.constant 0 : i32
    return %arg0, %c0_i32 : i32, i32
  }
  func.func @transform_1(%arg0: i32) -> (i32, i32) {
    %c0_i32 = arith.constant 0 : i32
    %c0_i32_0 = arith.constant 0 : i32
    %c0_i32_1 = arith.constant 0 : i32
    return %c0_i32, %c0_i32_0 : i32, i32
  }
  func.func @transform_2(%arg0: i32) -> (i32, i32) {
    %c0_i32 = arith.constant 0 : i32
    %c0_i32_0 = arith.constant 0 : i32
    %c0_i32_1 = arith.constant 0 : i32
    return %c0_i32, %c0_i32_0 : i32, i32
  }
  func.func @transform_3(%arg0: i32) -> (i32, i32) {
    %c0_i32 = arith.constant 0 : i32
    %c0_i32_0 = arith.constant 0 : i32
    return %arg0, %c0_i32 : i32, i32
  }
}

</mosaic_0001>

<bundles_post_ra>
// kernel: tpu_custom_call.1
= control target key start
LH: loop header
LB: loop body
LE: loop exit
PB: predicated region body
PF: predicated region fallthrough
CT: control target
= control target key end

     0   :  { %s837_s12 = smov 0   ;;  %s1156_s0 = inlined_call_operand.vmem [shape: f32[512,147], index: 0, kind: input, shape index: {}]   ;;  %s1157_s1 = inlined_call_operand.vmem [shape: f32[147,8], index: 1, kind: input, shape index: {}]   ;;  %s1158_s2 = inlined_call_operand.vmem [shape: f32[1,8], index: 2, kind: input, shape index: {}]   ;;  %s1159_s3 = inlined_call_operand.vmem [shape: f32[512,8], index: 3, kind: output, shape index: {}]  }
   0x1 LB: > { %s714_s13 = sadd.s32 4294967295, %s814_s12   ;;  %p718_p0 = scmp.ge.s32.totalorder %s814_s12, 1  ;;  %s814_s12 = sphi %s837_s12, %s13_s12  }
   0x2   : > { %p139_p1 = scmp.lt.s32.totalorder %s814_s12, 3 }
   0x4   : > { %p140_p2 = pnand %p718_p0, %p139_p1 }
   0x5   : > { %s719_s9 = sshll.u32 (!%p140_p2), %s714_s13, 5 }
   0x6   : > { %143 = sbr.rel (%p140_p2) target bundleno = 309 (0x135), region = 32  ;;  %p165_p3 = scmp.lt.s32.totalorder (!%p140_p2), %s719_s9, 63 }
   0xb   : > { %v256_v0 = vld [vmem:[%s1157_s1 + $0x78] sm:$0xff]  ;;  %v816_v1 = vmov 0.0   ;;  %v255_v2 = vld [vmem:[%s1157_s1 + $0x70] sm:$0xff]  ;;  %v254_v3 = vld [vmem:[%s1157_s1 + $0x68] sm:$0xff]  ;;  %s1161_s9 = smov (!%p165_p3, %s719_s9), 63  ;;  %vm364_vm0 = vcmask 1042432  }
   0xc   : > { %368 = vmatprep.subr.mxu0 %v816_v1  ;;  %761 = vmatprep.subr.mxu1 %v816_v1  ;;  %v253_v4 = vld [vmem:[%s1157_s1 + $0x60] sm:$0xff]  ;;  %v252_v5 = vld [vmem:[%s1157_s1 + $0x58] sm:$0xff]  ;;  %v251_v6 = vld [vmem:[%s1157_s1 + $0x50] sm:$0xff]  ;;  %s760_s21 = sshll.u32 %s1161_s9, 4  ;;  %vm267_vm1 = vcmask 154624   ;;  %s723_s6 = sshll.u32 %s1161_s9, 3 }
   0xd   : > { %369 = vmatpush1.msra.mxu0 %v256_v0  ;;  %780 = vmatpush1.msra.mxu1 %v256_v0  ;;  %v250_v7 = vld [vmem:[%s1157_s1 + $0x48] sm:$0xff]  ;;  %v249_v8 = vld [vmem:[%s1157_s1 + $0x40] sm:$0xff]  ;;  %v248_v9 = vld [vmem:[%s1157_s1 + $0x38] sm:$0xff]  ;;  %s941_s28 = scalar_lea.vmem %s1156_s0, %s760_s21  ;;  %s1057_s10 = scalar_lea.vmem %s1159_s3, %s723_s6  ;;  %vm625_vm2 = vcmask 64512  }
   0xe   : > { %370 = vmatprep.subr.mxu0 %v816_v1  ;;  %762 = vmatprep.subr.mxu1 %v816_v1  ;;  %v247_v10 = vld [vmem:[%s1157_s1 + $0x30] sm:$0xff]  ;;  %v246_v11 = vld [vmem:[%s1157_s1 + $0x28] sm:$0xff]  ;;  %v245_v12 = vld [vmem:[%s1157_s1 + $0x20] sm:$0xff] }
   0xf   : > { %371 = vmatpush1.msra.mxu0 %v255_v2  ;;  %781 = vmatpush1.msra.mxu1 %v255_v2  ;;  %v244_v13 = vld [vmem:[%s1157_s1 + $0x18] sm:$0xff]  ;;  %v243_v14 = vld [vmem:[%s1157_s1 + $0x10] sm:$0xff]  ;;  %v242_v15 = vld [vmem:[%s1157_s1 + $0x8] sm:$0xff] }
  0x10   : > { %372 = vmatprep.subr.mxu0 %v816_v1  ;;  %763 = vmatprep.subr.mxu1 %v816_v1  ;;  %v241_v16 = vld [vmem:[%s1157_s1] sm:$0xff]  ;;  %v259_v17 = vld [vmem:[%s1157_s1 + $0x90] sm:$0x7]  ;;  %v258_v18 = vld [vmem:[%s1157_s1 + $0x88] sm:$0xff] }
  0x11   : > { %373 = vmatpush1.msra.mxu0 %v254_v3  ;;  %782 = vmatpush1.msra.mxu1 %v254_v3  ;;  %v257_v19 = vld [vmem:[%s1157_s1 + $0x80] sm:$0xff]  ;;  %v178_v20 = vld [vmem:[%s941_s28 + $0x8] sm:$0xff]  ;;  %v180_v24 = vld [vmem:[%s941_s28 + $0x18] sm:$0xff] }
  0x12   : > { %374 = vmatprep.subr.mxu0 %v816_v1  ;;  %764 = vmatprep.subr.mxu1 %v816_v1  ;;  %v210_v21 = vld [vmem:[%s941_s28 + $0x108] sm:$0xff]  ;;  %v177_v22 = vld [vmem:[%s941_s28] sm:$0xff]  ;;  %v212_v25 = vld [vmem:[%s941_s28 + $0x118] sm:$0xff] }
  0x13   : > { %375 = vmatpush1.msra.mxu0 %v253_v4  ;;  %783 = vmatpush1.msra.mxu1 %v253_v4  ;;  %v209_v23 = vld [vmem:[%s941_s28 + $0x100] sm:$0xff]  ;;  %v179_v26 = vld [vmem:[%s941_s28 + $0x10] sm:$0xff]  ;;  %v182_v28 = vld [vmem:[%s941_s28 + $0x28] sm:$0xff] }
  0x14   : > { %376 = vmatprep.subr.mxu0 %v816_v1  ;;  %765 = vmatprep.subr.mxu1 %v816_v1  ;;  %v211_v27 = vld [vmem:[%s941_s28 + $0x110] sm:$0xff]  ;;  %v214_v29 = vld [vmem:[%s941_s28 + $0x128] sm:$0xff]  ;;  %v181_v30 = vld [vmem:[%s941_s28 + $0x20] sm:$0xff] }
  0x15   : > { %377 = vmatpush1.msra.mxu0 %v252_v5  ;;  %784 = vmatpush1.msra.mxu1 %v252_v5  ;;  %v213_v31 = vld [vmem:[%s941_s28 + $0x120] sm:$0xff]  ;;  %v184_v32 = vld [vmem:[%s941_s28 + $0x38] sm:$0xff]  ;;  %v183_v34 = vld [vmem:[%s941_s28 + $0x30] sm:$0xff] }
  0x16   : > { %378 = vmatprep.subr.mxu0 %v816_v1  ;;  %766 = vmatprep.subr.mxu1 %v816_v1  ;;  %v216_v33 = vld [vmem:[%s941_s28 + $0x138] sm:$0xff]  ;;  %v215_v35 = vld [vmem:[%s941_s28 + $0x130] sm:$0xff]  ;;  %v186_v36 = vld [vmem:[%s941_s28 + $0x48] sm:$0xff] }
  0x17   : > { %379 = vmatpush1.msra.mxu0 %v251_v6  ;;  %785 = vmatpush1.msra.mxu1 %v251_v6  ;;  %v218_v37 = vld [vmem:[%s941_s28 + $0x148] sm:$0xff]  ;;  %v185_v38 = vld [vmem:[%s941_s28 + $0x40] sm:$0xff]  ;;  %v188_v40 = vld [vmem:[%s941_s28 + $0x58] sm:$0xff] }
  0x18   : > { %380 = vmatprep.subr.mxu0 %v816_v1  ;;  %767 = vmatprep.subr.mxu1 %v816_v1  ;;  %v217_v39 = vld [vmem:[%s941_s28 + $0x140] sm:$0xff]  ;;  %v220_v41 = vld [vmem:[%s941_s28 + $0x158] sm:$0xff]  ;;  %v187_v42 = vld [vmem:[%s941_s28 + $0x50] sm:$0xff] }
  0x19   : > { %381 = vmatpush1.msra.mxu0 %v250_v7  ;;  %786 = vmatpush1.msra.mxu1 %v250_v7  ;;  %v219_v43 = vld [vmem:[%s941_s28 + $0x150] sm:$0xff]  ;;  %v190_v44 = vld [vmem:[%s941_s28 + $0x68] sm:$0xff]  ;;  %v189_v46 = vld [vmem:[%s941_s28 + $0x60] sm:$0xff] }
  0x1a   : > { %382 = vmatprep.subr.mxu0 %v816_v1  ;;  %768 = vmatprep.subr.mxu1 %v816_v1  ;;  %v222_v45 = vld [vmem:[%s941_s28 + $0x168] sm:$0xff]  ;;  %v221_v47 = vld [vmem:[%s941_s28 + $0x160] sm:$0xff]  ;;  %v192_v48 = vld [vmem:[%s941_s28 + $0x78] sm:$0xff] }
  0x1b   : > { %383 = vmatpush1.msra.mxu0 %v249_v8  ;;  %787 = vmatpush1.msra.mxu1 %v249_v8  ;;  %v224_v49 = vld [vmem:[%s941_s28 + $0x178] sm:$0xff]  ;;  %v191_v50 = vld [vmem:[%s941_s28 + $0x70] sm:$0xff]  ;;  %v194_v52 = vld [vmem:[%s941_s28 + $0x88] sm:$0xff] }
  0x1c   : > { %384 = vmatprep.subr.mxu0 %v816_v1  ;;  %769 = vmatprep.subr.mxu1 %v816_v1  ;;  %v223_v51 = vld [vmem:[%s941_s28 + $0x170] sm:$0xff]  ;;  %v226_v53 = vld [vmem:[%s941_s28 + $0x188] sm:$0xff]  ;;  %v193_v54 = vld [vmem:[%s941_s28 + $0x80] sm:$0xff] }
  0x1d   : > { %385 = vmatpush1.msra.mxu0 %v248_v9  ;;  %788 = vmatpush1.msra.mxu1 %v248_v9  ;;  %v225_v55 = vld [vmem:[%s941_s28 + $0x180] sm:$0xff]  ;;  %v196_v56 = vld [vmem:[%s941_s28 + $0x98] sm:$0xff]  ;;  %v195_v58 = vld [vmem:[%s941_s28 + $0x90] sm:$0xff] }
  0x1e   : > { %386 = vmatprep.subr.mxu0 %v816_v1  ;;  %770 = vmatprep.subr.mxu1 %v816_v1  ;;  %v228_v57 = vld [vmem:[%s941_s28 + $0x198] sm:$0xff]  ;;  %v227_v59 = vld [vmem:[%s941_s28 + $0x190] sm:$0xff]  ;;  %v198_v60 = vld [vmem:[%s941_s28 + $0xa8] sm:$0xff] }
  0x1f   : > { %387 = vmatpush1.msra.mxu0 %v247_v10  ;;  %789 = vmatpush1.msra.mxu1 %v247_v10  ;;  %v230_v61 = vld [vmem:[%s941_s28 + $0x1a8] sm:$0xff]  ;;  %v197_v62 = vld [vmem:[%s941_s28 + $0xa0] sm:$0xff]  ;;  %v200_v0 = vld [vmem:[%s941_s28 + $0xb8] sm:$0xff] }
  0x20   : > { %388 = vmatprep.subr.mxu0 %v816_v1  ;;  %771 = vmatprep.subr.mxu1 %v816_v1  ;;  %v229_v63 = vld [vmem:[%s941_s28 + $0x1a0] sm:$0xff]  ;;  %v199_v2 = vld [vmem:[%s941_s28 + $0xb0] sm:$0xff]  ;;  %v202_v4 = vld [vmem:[%s941_s28 + $0xc8] sm:$0xff] }
  0x21   : > { %389 = vmatpush1.msra.mxu0 %v246_v11  ;;  %790 = vmatpush1.msra.mxu1 %v246_v11  ;;  %v231_v3 = vld [vmem:[%s941_s28 + $0x1b0] sm:$0xff]  ;;  %v234_v5 = vld [vmem:[%s941_s28 + $0x1c8] sm:$0xff]  ;;  %v201_v6 = vld [vmem:[%s941_s28 + $0xc0] sm:$0xff] }
  0x22   : > { %390 = vmatprep.subr.mxu0 %v816_v1  ;;  %772 = vmatprep.subr.mxu1 %v816_v1  ;;  %v233_v7 = vld [vmem:[%s941_s28 + $0x1c0] sm:$0xff]  ;;  %v204_v8 = vld [vmem:[%s941_s28 + $0xd8] sm:$0xff]  ;;  %v203_v10 = vld [vmem:[%s941_s28 + $0xd0] sm:$0xff] }
  0x23   : > { %391 = vmatpush1.msra.mxu0 %v245_v12  ;;  %791 = vmatpush1.msra.mxu1 %v245_v12  ;;  %v236_v9 = vld [vmem:[%s941_s28 + $0x1d8] sm:$0xff]  ;;  %v235_v11 = vld [vmem:[%s941_s28 + $0x1d0] sm:$0xff]  ;;  %v206_v12 = vld [vmem:[%s941_s28 + $0xe8] sm:$0xff] }
  0x24   : > { %392 = vmatprep.subr.mxu0 %v816_v1  ;;  %773 = vmatprep.subr.mxu1 %v816_v1 }
  0x25   : > { %393 = vmatpush1.msra.mxu0 %v244_v13  ;;  %792 = vmatpush1.msra.mxu1 %v244_v13  ;;  %v238_v13 = vld [vmem:[%s941_s28 + $0x1e8] sm:$0xff] }
  0x26   : > { %394 = vmatprep.subr.mxu0 %v816_v1  ;;  %774 = vmatprep.subr.mxu1 %v816_v1 }
  0x27   : > { %395 = vmatpush1.msra.mxu0 %v243_v14  ;;  %793 = vmatpush1.msra.mxu1 %v243_v14  ;;  %v205_v14 = vld [vmem:[%s941_s28 + $0xe0] sm:$0xff] }
  0x28   : > { %396 = vmatprep.subr.mxu0 %v816_v1  ;;  %775 = vmatprep.subr.mxu1 %v816_v1 }
  0x29   : > { %397 = vmatpush1.msra.mxu0 %v242_v15  ;;  %794 = vmatpush1.msra.mxu1 %v242_v15  ;;  %v237_v15 = vld [vmem:[%s941_s28 + $0x1e0] sm:$0xff] }
  0x2a   : > { %398 = vmatprep.subr.mxu0 %v816_v1  ;;  %776 = vmatprep.subr.mxu1 %v816_v1 }
  0x2b   : > { %399 = vmatpush1.msra.mxu0 %v241_v16  ;;  %795 = vmatpush1.msra.mxu1 %v241_v16  ;;  %v208_v16 = vld [vmem:[%s941_s28 + $0xf8] sm:$0xff] }
  0x2c   : > { %426 = vmatprep.subr.mxu0 %v816_v1  ;;  %777 = vmatprep.subr.mxu1 %v816_v1 }
  0x2d   : > { %725 = vmatpush2.msk.msra.mxu0 %vm364_vm0, %v259_v17  ;;  %796 = vmatpush2.msk.msra.mxu1 %vm364_vm0, %v259_v17  ;;  %v240_v17 = vld [vmem:[%s941_s28 + $0x1f8] sm:$0xff] }
  0x2e   : > { %428 = vmatprep.subr.mxu0 %v816_v1  ;;  %778 = vmatprep.subr.mxu1 %v816_v1 }
  0x2f   : > { %429 = vmatpush2.msra.mxu0 %v258_v18  ;;  %797 = vmatpush2.msra.mxu1 %v258_v18  ;;  %v207_v18 = vld [vmem:[%s941_s28 + $0xf0] sm:$0xff] }
  0x30   : > { %430 = vmatprep.subr.mxu0 %v816_v1  ;;  %779 = vmatprep.subr.mxu1 %v816_v1  ;;  %v232_v1 = vld [vmem:[%s941_s28 + $0x1b8] sm:$0xff] }
  0x31   : > { %431 = vmatpush2.msra.mxu0 %v257_v19  ;;  %798 = vmatpush2.msra.mxu1 %v257_v19  ;;  %v239_v19 = vld [vmem:[%s941_s28 + $0x1f0] sm:$0xff] }
  0x32   : > { %726 = vmatprep.mubr.msk.f32.mxu0 %vm267_vm1, %v178_v20  ;;  %742 = vmatprep.mubr.msk.f32.mxu1 %vm267_vm1, %v210_v21  ;;  %v1049_v20 = vld [vmem:[%s1158_s2] ss:$0 sm:$0xff] }
  0x33   : > { %433 = vmatmul.mubr.f32.vlgmr.msra.gmra.mxu0 %v177_v22  ;;  %513 = vmatmul.mubr.f32.vlgmr.msra.gmra.mxu1 %v209_v23 }
  0x34   : > { %727 = vmatprep.mubr.msk.f32.mxu0 %vm267_vm1, %v180_v24  ;;  %743 = vmatprep.mubr.msk.f32.mxu1 %vm267_vm1, %v212_v25 }
  0x37   : > { %438 = vmatmul.mubr.f32.gmra.mxu0 %v179_v26  ;;  %518 = vmatmul.mubr.f32.gmra.mxu1 %v211_v27 }
  0x38   : > { %728 = vmatprep.mubr.msk.f32.mxu0 %vm267_vm1, %v182_v28  ;;  %744 = vmatprep.mubr.msk.f32.mxu1 %vm267_vm1, %v214_v29 }
  0x3b   : > { %443 = vmatmul.mubr.f32.gmra.mxu0 %v181_v30  ;;  %523 = vmatmul.mubr.f32.gmra.mxu1 %v213_v31 }
  0x3c   : > { %729 = vmatprep.mubr.msk.f32.mxu0 %vm267_vm1, %v184_v32  ;;  %745 = vmatprep.mubr.msk.f32.mxu1 %vm267_vm1, %v216_v33 }
  0x3f   : > { %448 = vmatmul.mubr.f32.gmra.mxu0 %v183_v34  ;;  %528 = vmatmul.mubr.f32.gmra.mxu1 %v215_v35 }
  0x40   : > { %730 = vmatprep.mubr.msk.f32.mxu0 %vm267_vm1, %v186_v36  ;;  %746 = vmatprep.mubr.msk.f32.mxu1 %vm267_vm1, %v218_v37 }
  0x43   : > { %453 = vmatmul.mubr.f32.gmra.mxu0 %v185_v38  ;;  %533 = vmatmul.mubr.f32.gmra.mxu1 %v217_v39 }
  0x44   : > { %731 = vmatprep.mubr.msk.f32.mxu0 %vm267_vm1, %v188_v40  ;;  %747 = vmatprep.mubr.msk.f32.mxu1 %vm267_vm1, %v220_v41 }
  0x47   : > { %458 = vmatmul.mubr.f32.gmra.mxu0 %v187_v42  ;;  %538 = vmatmul.mubr.f32.gmra.mxu1 %v219_v43 }
  0x48   : > { %732 = vmatprep.mubr.msk.f32.mxu0 %vm267_vm1, %v190_v44  ;;  %748 = vmatprep.mubr.msk.f32.mxu1 %vm267_vm1, %v222_v45 }
  0x4b   : > { %463 = vmatmul.mubr.f32.gmra.mxu0 %v189_v46  ;;  %543 = vmatmul.mubr.f32.gmra.mxu1 %v221_v47 }
  0x4c   : > { %733 = vmatprep.mubr.msk.f32.mxu0 %vm267_vm1, %v192_v48  ;;  %749 = vmatprep.mubr.msk.f32.mxu1 %vm267_vm1, %v224_v49 }
  0x4f   : > { %468 = vmatmul.mubr.f32.gmra.mxu0 %v191_v50  ;;  %548 = vmatmul.mubr.f32.gmra.mxu1 %v223_v51 }
  0x50   : > { %734 = vmatprep.mubr.msk.f32.mxu0 %vm267_vm1, %v194_v52  ;;  %750 = vmatprep.mubr.msk.f32.mxu1 %vm267_vm1, %v226_v53 }
  0x53   : > { %473 = vmatmul.mubr.f32.gmra.mxu0 %v193_v54  ;;  %553 = vmatmul.mubr.f32.gmra.mxu1 %v225_v55 }
  0x54   : > { %735 = vmatprep.mubr.msk.f32.mxu0 %vm267_vm1, %v196_v56  ;;  %751 = vmatprep.mubr.msk.f32.mxu1 %vm267_vm1, %v228_v57 }
  0x57   : > { %478 = vmatmul.mubr.f32.gmra.mxu0 %v195_v58  ;;  %558 = vmatmul.mubr.f32.gmra.mxu1 %v227_v59 }
  0x58   : > { %736 = vmatprep.mubr.msk.f32.mxu0 %vm267_vm1, %v198_v60  ;;  %752 = vmatprep.mubr.msk.f32.mxu1 %vm267_vm1, %v230_v61 }
  0x5b   : > { %483 = vmatmul.mubr.f32.gmra.mxu0 %v197_v62  ;;  %563 = vmatmul.mubr.f32.gmra.mxu1 %v229_v63 }
  0x5c   : > { %737 = vmatprep.mubr.msk.f32.mxu0 %vm267_vm1, %v200_v0  ;;  %753 = vmatprep.mubr.msk.f32.mxu1 %vm267_vm1, %v232_v1 }
  0x5f   : > { %488 = vmatmul.mubr.f32.gmra.mxu0 %v199_v2  ;;  %568 = vmatmul.mubr.f32.gmra.mxu1 %v231_v3 }
  0x60   : > { %738 = vmatprep.mubr.msk.f32.mxu0 %vm267_vm1, %v202_v4  ;;  %754 = vmatprep.mubr.msk.f32.mxu1 %vm267_vm1, %v234_v5 }
  0x63   : > { %493 = vmatmul.mubr.f32.gmra.mxu0 %v201_v6  ;;  %573 = vmatmul.mubr.f32.gmra.mxu1 %v233_v7 }
  0x64   : > { %739 = vmatprep.mubr.msk.f32.mxu0 %vm267_vm1, %v204_v8  ;;  %755 = vmatprep.mubr.msk.f32.mxu1 %vm267_vm1, %v236_v9 }
  0x67   : > { %498 = vmatmul.mubr.f32.gmra.mxu0 %v203_v10  ;;  %578 = vmatmul.mubr.f32.gmra.mxu1 %v235_v11 }
  0x68   : > { %740 = vmatprep.mubr.msk.f32.mxu0 %vm267_vm1, %v206_v12  ;;  %756 = vmatprep.mubr.msk.f32.mxu1 %vm267_vm1, %v238_v13 }
  0x6b   : > { %503 = vmatmul.mubr.f32.gmra.mxu0 %v205_v14  ;;  %583 = vmatmul.mubr.f32.gmra.mxu1 %v237_v15 }
  0x6c   : > { %741 = vmatprep.mubr.msk.f32.mxu0 %vm267_vm1, %v208_v16  ;;  %757 = vmatprep.mubr.msk.f32.mxu1 %vm267_vm1, %v240_v17 }
  0x6f   : > { %508 = vmatmul.mubr.f32.gmra.mxu0 %v207_v18  ;;  %588 = vmatmul.mubr.f32.gmra.mxu1 %v239_v19 }
  0xf3   : > { %v434_v21 = vpop.f32.mrf.mxu0  ;;  %v514_v22 = vpop.f32.mrf.mxu1 }
  0xf4   : > { %v435_v23 = vadd.f32 %v1049_v20, %v434_v21  ;;  %v515_v24 = vadd.f32 %v1049_v20, %v514_v22 }
  0xf5   : > { %v436_v25 = vpop.f32.mrf.mxu0  ;;  %v516_v26 = vpop.f32.mrf.mxu1 }
  0xf6   : > { %v593_v27 = vmax.f32 %v435_v23, 0.0  ;;  %v609_v28 = vmax.f32 %v515_v24, 0.0 }
  0xf7   : > { %v439_v29 = vpop.f32.mrf.mxu0  ;;  %v519_v30 = vpop.f32.mrf.mxu1 }
  0xf8   : > { %626 = vst.msk [vmem:[%s1057_s10] sm:$0xff] %vm625_vm2, %v593_v27  ;;  %642 = vst.msk [vmem:[%s1057_s10 + $0x80] sm:$0xff] %vm625_vm2, %v609_v28  ;;  %v440_v31 = vadd.f32 %v1049_v20, %v439_v29  ;;  %v520_v32 = vadd.f32 %v1049_v20, %v519_v30 }
  0xf9   : > { %v441_v33 = vpop.f32.mrf.mxu0  ;;  %v521_v34 = vpop.f32.mrf.mxu1 }
  0xfa   : > { %v594_v35 = vmax.f32 %v440_v31, 0.0  ;;  %v610_v36 = vmax.f32 %v520_v32, 0.0 }
  0xfb   : > { %v444_v37 = vpop.f32.mrf.mxu0  ;;  %v524_v38 = vpop.f32.mrf.mxu1 }
  0xfc   : > { %627 = vst.msk [vmem:[%s1057_s10 + $0x8] sm:$0xff] %vm625_vm2, %v594_v35  ;;  %643 = vst.msk [vmem:[%s1057_s10 + $0x88] sm:$0xff] %vm625_vm2, %v610_v36  ;;  %v445_v39 = vadd.f32 %v1049_v20, %v444_v37  ;;  %v525_v40 = vadd.f32 %v1049_v20, %v524_v38 }
  0xfd   : > { %v446_v41 = vpop.f32.mrf.mxu0  ;;  %v526_v42 = vpop.f32.mrf.mxu1 }
  0xfe   : > { %v595_v43 = vmax.f32 %v445_v39, 0.0  ;;  %v611_v44 = vmax.f32 %v525_v40, 0.0 }
  0xff   : > { %v449_v45 = vpop.f32.mrf.mxu0  ;;  %v529_v46 = vpop.f32.mrf.mxu1 }
 0x100   : > { %628 = vst.msk [vmem:[%s1057_s10 + $0x10] sm:$0xff] %vm625_vm2, %v595_v43  ;;  %644 = vst.msk [vmem:[%s1057_s10 + $0x90] sm:$0xff] %vm625_vm2, %v611_v44  ;;  %v450_v47 = vadd.f32 %v1049_v20, %v449_v45  ;;  %v530_v48 = vadd.f32 %v1049_v20, %v529_v46 }
 0x101   : > { %v451_v49 = vpop.f32.mrf.mxu0  ;;  %v531_v50 = vpop.f32.mrf.mxu1 }
 0x102   : > { %v596_v51 = vmax.f32 %v450_v47, 0.0  ;;  %v612_v52 = vmax.f32 %v530_v48, 0.0 }
 0x103   : > { %v454_v53 = vpop.f32.mrf.mxu0  ;;  %v534_v54 = vpop.f32.mrf.mxu1 }
 0x104   : > { %629 = vst.msk [vmem:[%s1057_s10 + $0x18] sm:$0xff] %vm625_vm2, %v596_v51  ;;  %645 = vst.msk [vmem:[%s1057_s10 + $0x98] sm:$0xff] %vm625_vm2, %v612_v52  ;;  %v455_v55 = vadd.f32 %v1049_v20, %v454_v53  ;;  %v535_v56 = vadd.f32 %v1049_v20, %v534_v54 }
 0x105   : > { %v456_v57 = vpop.f32.mrf.mxu0  ;;  %v536_v58 = vpop.f32.mrf.mxu1 }
 0x106   : > { %v597_v59 = vmax.f32 %v455_v55, 0.0  ;;  %v613_v60 = vmax.f32 %v535_v56, 0.0 }
 0x107   : > { %v459_v61 = vpop.f32.mrf.mxu0  ;;  %v539_v62 = vpop.f32.mrf.mxu1 }
 0x108   : > { %630 = vst.msk [vmem:[%s1057_s10 + $0x20] sm:$0xff] %vm625_vm2, %v597_v59  ;;  %646 = vst.msk [vmem:[%s1057_s10 + $0xa0] sm:$0xff] %vm625_vm2, %v613_v60  ;;  %v460_v63 = vadd.f32 %v1049_v20, %v459_v61  ;;  %v540_v0 = vadd.f32 %v1049_v20, %v539_v62 }
 0x109   : > { %v461_v1 = vpop.f32.mrf.mxu0  ;;  %v541_v2 = vpop.f32.mrf.mxu1 }
 0x10a   : > { %v598_v3 = vmax.f32 %v460_v63, 0.0  ;;  %v614_v4 = vmax.f32 %v540_v0, 0.0 }
 0x10b   : > { %v464_v5 = vpop.f32.mrf.mxu0  ;;  %v544_v6 = vpop.f32.mrf.mxu1 }
 0x10c   : > { %631 = vst.msk [vmem:[%s1057_s10 + $0x28] sm:$0xff] %vm625_vm2, %v598_v3  ;;  %647 = vst.msk [vmem:[%s1057_s10 + $0xa8] sm:$0xff] %vm625_vm2, %v614_v4  ;;  %v465_v7 = vadd.f32 %v1049_v20, %v464_v5  ;;  %v545_v8 = vadd.f32 %v1049_v20, %v544_v6 }
 0x10d   : > { %v466_v9 = vpop.f32.mrf.mxu0  ;;  %v546_v10 = vpop.f32.mrf.mxu1 }
 0x10e   : > { %v599_v11 = vmax.f32 %v465_v7, 0.0  ;;  %v615_v12 = vmax.f32 %v545_v8, 0.0 }
 0x10f   : > { %v469_v13 = vpop.f32.mrf.mxu0  ;;  %v549_v14 = vpop.f32.mrf.mxu1 }
 0x110   : > { %632 = vst.msk [vmem:[%s1057_s10 + $0x30] sm:$0xff] %vm625_vm2, %v599_v11  ;;  %648 = vst.msk [vmem:[%s1057_s10 + $0xb0] sm:$0xff] %vm625_vm2, %v615_v12  ;;  %v470_v15 = vadd.f32 %v1049_v20, %v469_v13  ;;  %v550_v16 = vadd.f32 %v1049_v20, %v549_v14 }
 0x111   : > { %v471_v17 = vpop.f32.mrf.mxu0  ;;  %v551_v18 = vpop.f32.mrf.mxu1 }
 0x112   : > { %v600_v19 = vmax.f32 %v470_v15, 0.0  ;;  %v616_v21 = vmax.f32 %v550_v16, 0.0 }
 0x113   : > { %v474_v22 = vpop.f32.mrf.mxu0  ;;  %v554_v23 = vpop.f32.mrf.mxu1 }
 0x114   : > { %633 = vst.msk [vmem:[%s1057_s10 + $0x38] sm:$0xff] %vm625_vm2, %v600_v19  ;;  %649 = vst.msk [vmem:[%s1057_s10 + $0xb8] sm:$0xff] %vm625_vm2, %v616_v21  ;;  %v475_v24 = vadd.f32 %v1049_v20, %v474_v22  ;;  %v555_v25 = vadd.f32 %v1049_v20, %v554_v23 }
 0x115   : > { %v476_v26 = vpop.f32.mrf.mxu0  ;;  %v556_v27 = vpop.f32.mrf.mxu1 }
 0x116   : > { %v601_v28 = vmax.f32 %v475_v24, 0.0  ;;  %v617_v29 = vmax.f32 %v555_v25, 0.0 }
 0x117   : > { %v479_v30 = vpop.f32.mrf.mxu0  ;;  %v559_v31 = vpop.f32.mrf.mxu1 }
 0x118   : > { %634 = vst.msk [vmem:[%s1057_s10 + $0x40] sm:$0xff] %vm625_vm2, %v601_v28  ;;  %650 = vst.msk [vmem:[%s1057_s10 + $0xc0] sm:$0xff] %vm625_vm2, %v617_v29  ;;  %v480_v32 = vadd.f32 %v1049_v20, %v479_v30  ;;  %v560_v33 = vadd.f32 %v1049_v20, %v559_v31 }
 0x119   : > { %v481_v34 = vpop.f32.mrf.mxu0  ;;  %v561_v35 = vpop.f32.mrf.mxu1 }
 0x11a   : > { %v602_v36 = vmax.f32 %v480_v32, 0.0  ;;  %v618_v37 = vmax.f32 %v560_v33, 0.0 }
 0x11b   : > { %v484_v38 = vpop.f32.mrf.mxu0  ;;  %v564_v39 = vpop.f32.mrf.mxu1 }
 0x11c   : > { %635 = vst.msk [vmem:[%s1057_s10 + $0x48] sm:$0xff] %vm625_vm2, %v602_v36  ;;  %651 = vst.msk [vmem:[%s1057_s10 + $0xc8] sm:$0xff] %vm625_vm2, %v618_v37  ;;  %v485_v40 = vadd.f32 %v1049_v20, %v484_v38  ;;  %v565_v41 = vadd.f32 %v1049_v20, %v564_v39 }
 0x11d   : > { %v486_v42 = vpop.f32.mrf.mxu0  ;;  %v566_v43 = vpop.f32.mrf.mxu1 }
 0x11e   : > { %v603_v44 = vmax.f32 %v485_v40, 0.0  ;;  %v619_v45 = vmax.f32 %v565_v41, 0.0 }
 0x11f   : > { %v489_v46 = vpop.f32.mrf.mxu0  ;;  %v569_v47 = vpop.f32.mrf.mxu1 }
 0x120   : > { %636 = vst.msk [vmem:[%s1057_s10 + $0x50] sm:$0xff] %vm625_vm2, %v603_v44  ;;  %652 = vst.msk [vmem:[%s1057_s10 + $0xd0] sm:$0xff] %vm625_vm2, %v619_v45  ;;  %v490_v48 = vadd.f32 %v1049_v20, %v489_v46  ;;  %v570_v49 = vadd.f32 %v1049_v20, %v569_v47 }
 0x121   : > { %v491_v50 = vpop.f32.mrf.mxu0  ;;  %v571_v51 = vpop.f32.mrf.mxu1 }
 0x122   : > { %v604_v52 = vmax.f32 %v490_v48, 0.0  ;;  %v620_v53 = vmax.f32 %v570_v49, 0.0 }
 0x123   : > { %v494_v54 = vpop.f32.mrf.mxu0  ;;  %v574_v55 = vpop.f32.mrf.mxu1 }
 0x124   : > { %637 = vst.msk [vmem:[%s1057_s10 + $0x58] sm:$0xff] %vm625_vm2, %v604_v52  ;;  %653 = vst.msk [vmem:[%s1057_s10 + $0xd8] sm:$0xff] %vm625_vm2, %v620_v53  ;;  %v495_v56 = vadd.f32 %v1049_v20, %v494_v54  ;;  %v575_v57 = vadd.f32 %v1049_v20, %v574_v55 }
 0x125   : > { %v496_v58 = vpop.f32.mrf.mxu0  ;;  %v576_v59 = vpop.f32.mrf.mxu1 }
 0x126   : > { %v605_v60 = vmax.f32 %v495_v56, 0.0  ;;  %v621_v61 = vmax.f32 %v575_v57, 0.0 }
 0x127   : > { %v499_v62 = vpop.f32.mrf.mxu0  ;;  %v579_v63 = vpop.f32.mrf.mxu1 }
 0x128   : > { %638 = vst.msk [vmem:[%s1057_s10 + $0x60] sm:$0xff] %vm625_vm2, %v605_v60  ;;  %654 = vst.msk [vmem:[%s1057_s10 + $0xe0] sm:$0xff] %vm625_vm2, %v621_v61  ;;  %v500_v0 = vadd.f32 %v1049_v20, %v499_v62  ;;  %v580_v1 = vadd.f32 %v1049_v20, %v579_v63 }
 0x129   : > { %v501_v2 = vpop.f32.mrf.mxu0  ;;  %v581_v3 = vpop.f32.mrf.mxu1 }
 0x12a   : > { %v606_v4 = vmax.f32 %v500_v0, 0.0  ;;  %v622_v5 = vmax.f32 %v580_v1, 0.0 }
 0x12b   : > { %v504_v6 = vpop.f32.mrf.mxu0  ;;  %v584_v7 = vpop.f32.mrf.mxu1 }
 0x12c   : > { %639 = vst.msk [vmem:[%s1057_s10 + $0x68] sm:$0xff] %vm625_vm2, %v606_v4  ;;  %655 = vst.msk [vmem:[%s1057_s10 + $0xe8] sm:$0xff] %vm625_vm2, %v622_v5  ;;  %v505_v8 = vadd.f32 %v1049_v20, %v504_v6  ;;  %v585_v9 = vadd.f32 %v1049_v20, %v584_v7 }
 0x12d   : > { %v506_v10 = vpop.f32.mrf.mxu0  ;;  %v586_v11 = vpop.f32.mrf.mxu1 }
 0x12e   : > { %v607_v12 = vmax.f32 %v505_v8, 0.0  ;;  %v623_v13 = vmax.f32 %v585_v9, 0.0 }
 0x12f   : > { %v509_v14 = vpop.f32.mrf.mxu0  ;;  %v589_v15 = vpop.f32.mrf.mxu1 }
 0x130   : > { %640 = vst.msk [vmem:[%s1057_s10 + $0x70] sm:$0xff] %vm625_vm2, %v607_v12  ;;  %656 = vst.msk [vmem:[%s1057_s10 + $0xf0] sm:$0xff] %vm625_vm2, %v623_v13  ;;  %v510_v16 = vadd.f32 %v1049_v20, %v509_v14  ;;  %v590_v17 = vadd.f32 %v1049_v20, %v589_v15 }
 0x131   : > { %v511_v18 = vpop.f32.mrf.mxu0  ;;  %v591_v19 = vpop.f32.mrf.mxu1 }
 0x132   : > { %v608_v21 = vmax.f32 %v510_v16, 0.0  ;;  %v624_v22 = vmax.f32 %v590_v17, 0.0 }
 0x134   : > { %641 = vst.msk [vmem:[%s1057_s10 + $0x78] sm:$0xff] %vm625_vm2, %v608_v21  ;;  %657 = vst.msk [vmem:[%s1057_s10 + $0xf8] sm:$0xff] %vm625_vm2, %v624_v22 }
 0x135 PF: > { %s13_s12 = sadd.s32 1, %s814_s12  }
 0x136   : > { %p10_p4 = scmp.ge.s32.totalorder %s13_s12, 4  }
 0x138   :  { %12 = sbr.rel (!%p10_p4) target bundleno = 1 (0x1), region = 62 }

</bundles_post_ra>
